<compile_context>
chip_gen: v7x
topology: tpu7x:2x2x1
jax: 0.10.0
libtpu: 0.0.40
codegen_flags: <defaults>
</compile_context>

<pallas_src>
import functools

import jax
import jax.numpy as jnp
from jax.experimental import pallas as pl
from jax.experimental.pallas import tpu as pltpu


def _round_up(v, m):
    return ((v + m - 1) // m) * m


def _saliency_kernel(x_ref, w1_ref, b1_ref, s2_ref, b2_ref, o_ref):
    # x_ref : (TILE_R, PW) f32 VMEM  packed points: row r, lane-group gi holds
    #                                 the C features of point r*G + gi
    # w1_ref: (G*H, PW)    f32 VMEM  block-diagonal-replicated W1^T
    # b1_ref: (G*H, 1)     f32 VMEM  b1 replicated per group (column)
    # s2_ref: (G, G*H)     f32 VMEM  per-group W2 selection matrix
    # b2_ref: (1,)         f32 SMEM  second bias (scalar)
    # o_ref : (G, TILE_R)            lane-dense, group-major saliency output
    x = x_ref[...]

    # Linear 1 (MXU, f32 accumulation), transposed so packed rows land in
    # lanes:  h[gi*H + hh, r] = sum_c W1[c, hh] * x_orig[r*G + gi, c].
    h = jax.lax.dot_general(
        w1_ref[...], x,
        dimension_numbers=(((1,), (1,)), ((), ())),
        preferred_element_type=jnp.float32,
    )                                                   # (G*H, TILE_R)
    h = jnp.maximum(h + b1_ref[...], 0.0)               # bias + ReLU (VPU)

    # Linear 2 (H -> 1 per group): tiny MXU matmul folds the W2 multiply and
    # the per-group reduction; result stays lane-dense.
    logits = jnp.dot(s2_ref[...], h, preferred_element_type=jnp.float32)
    logits = logits + b2_ref[0]                         # (G, TILE_R)

    # Sigmoid on the EUP via tanh (full f32 precision, no VALU divide).
    o_ref[...] = (0.5 * jnp.tanh(0.5 * logits) + 0.5).astype(o_ref.dtype)


@functools.partial(jax.jit, static_argnames=("tile_points",))
def saliency_regressor(x, w1, b1, w2, b2, *, tile_points=16384):
    """x: (N, C) point features.  Returns (N, 1) saliency in [0, 1]."""
    n, c = x.shape
    hidden = w1.shape[1]
    dtype = x.dtype

    # Pack G points per 128-lane row when C divides 128 (fallback: G = 1,
    # which reproduces the plain points-in-lanes formulation).
    g = 128 // c if (c <= 128 and 128 % c == 0) else 1
    pw = g * c                      # packed row width (128 in the main case)
    gh = g * hidden

    n_pad = _round_up(n, g)
    if n_pad != n:
        # Only hit when N % G != 0 (copies x once; avoided for aligned N).
        x = jnp.pad(x, ((0, n_pad - n), (0, 0)))
    rn = n_pad // g
    xp = x.reshape(rn, pw)          # free, contiguous row-major view

    # Cheap weight re-layouts (tiny, once per call, outside the kernel).
    eye_g = jnp.eye(g, dtype=dtype)
    w1bdt = jnp.kron(eye_g, w1.T.astype(dtype))                   # (G*H, PW)
    b1c = jnp.tile(b1.reshape(-1).astype(dtype), g).reshape(gh, 1)  # (G*H, 1)
    s2 = jnp.kron(eye_g, w2.reshape(1, hidden).astype(dtype))     # (G, G*H)
    b2s = b2.reshape(1).astype(dtype)                             # (1,) SMEM

    # --- Tile / grid sizing ------------------------------------------------
    # Large point tiles amortize the ~0.35 us per-grid-step overhead; the
    # packed layout keeps a 16384-point tile at only 2 MiB per buffer.
    tile_r = max(128, (max(1, tile_points // g) // 128) * 128)
    tile_r = min(tile_r, _round_up(rn, 128))
    # Keep >= 4 balanced grid steps when there is enough work so v7x's two
    # TensorCores (parallel axis) each get >= 2 double-buffered steps.
    if rn >= 4 * 128:
        tile_r = max(128, min(tile_r, _round_up(pl.cdiv(rn, 4), 128)))
    grid = (pl.cdiv(rn, tile_r),)

    # Explicit scoped-VMEM budget sized for the padded buffers (x + out
    # double-buffered, weights, intermediates) with headroom; stays well
    # under v7x's 64 MiB physical VMEM.
    x_tile_bytes = tile_r * _round_up(pw, 128) * 4
    out_tile_bytes = _round_up(g, 8) * _round_up(tile_r, 128) * 4
    w_bytes = (_round_up(gh, 8) * _round_up(pw, 128)
               + _round_up(gh, 8) * 128
               + _round_up(g, 8) * _round_up(gh, 128)) * 4
    vmem_limit = 2 * (x_tile_bytes + out_tile_bytes + w_bytes) + (4 << 20)
    vmem_limit = int(min(max(vmem_limit, 16 << 20), 32 << 20))

    out = pl.pallas_call(
        _saliency_kernel,
        out_shape=jax.ShapeDtypeStruct((g, rn), dtype),
        grid=grid,
        in_specs=[
            pl.BlockSpec((tile_r, pw), lambda i: (i, 0)),        # packed x
            pl.BlockSpec((gh, pw), lambda i: (0, 0)),            # W1^T blkdiag
            pl.BlockSpec((gh, 1), lambda i: (0, 0)),             # b1 column
            pl.BlockSpec((g, gh), lambda i: (0, 0)),             # S2 selection
            pl.BlockSpec(memory_space=pltpu.MemorySpace.SMEM),   # b2 scalar
        ],
        out_specs=pl.BlockSpec((g, tile_r), lambda i: (0, i)),   # lane-dense
        compiler_params=pltpu.CompilerParams(
            dimension_semantics=("parallel",),
            vmem_limit_bytes=vmem_limit,
        ),
    )(xp, w1bdt, b1c, s2, b2s)

    # (G, RN) group-major -> (N, 1) point order: point r*G + gi sits at
    # out[gi, r].  Tiny (4 B/point) transpose — layout plumbing only.
    y = out.T.reshape(n_pad, 1)
    return y[:n] if n_pad != n else y


def init_params(key, in_channels, reduction=2, dtype=jnp.float32):
    """Deterministic synthetic init mirroring nn.Linear shapes
    (uniform(-1/sqrt(fan_in), 1/sqrt(fan_in)), like PyTorch defaults)."""
    hidden = in_channels // reduction
    k1, k2, k3, k4 = jax.random.split(key, 4)
    bound1 = 1.0 / jnp.sqrt(in_channels)
    bound2 = 1.0 / jnp.sqrt(hidden)
    w1 = jax.random.uniform(k1, (in_channels, hidden), dtype, -bound1, bound1)
    b1 = jax.random.uniform(k2, (1, hidden), dtype, -bound1, bound1)
    w2 = jax.random.uniform(k3, (hidden, 1), dtype, -bound2, bound2)
    b2 = jax.random.uniform(k4, (1, 1), dtype, -bound2, bound2)
    return w1, b1, w2, b2


def reference(x, w1, b1, w2, b2):
    h = jnp.maximum(x @ w1 + b1, 0.0)
    return jax.nn.sigmoid(h @ w2 + b2)


if __name__ == "__main__":
    in_channels = 32   # C of the sparse-tensor features
    reduction = 2

    key = jax.random.PRNGKey(0)
    kx, kp, kb = jax.random.split(key, 3)
    w1, b1, w2, b2 = init_params(kp, in_channels, reduction)

    # Tolerances: tanh-based sigmoid + MXU f32 passes vs the XLA reference —
    # keep a small margin while remaining a tight functional check.
    ATOL = RTOL = 1e-4

    # Case 1: ragged point count (N % 4 != 0 and N % tile != 0) with a small
    # tile — exercises the pad path, several grid steps and the masked
    # boundary block.
    n_points = 1003
    x = jax.random.normal(kx, (n_points, in_channels), jnp.float32)
    out = jax.block_until_ready(
        saliency_regressor(x, w1, b1, w2, b2, tile_points=512))
    ref = reference(x, w1, b1, w2, b2)
    assert out.shape == (n_points, 1)
    assert jnp.allclose(out, ref, atol=ATOL, rtol=RTOL), "mismatch vs reference (ragged)"
    assert bool(jnp.all((out >= 0.0) & (out <= 1.0)))

    # Case 2: default large-tile path (grid clamped to >= 4 balanced steps).
    n_big = 8192
    xb = jax.random.normal(kb, (n_big, in_channels), jnp.float32)
    outb = jax.block_until_ready(saliency_regressor(xb, w1, b1, w2, b2))
    refb = reference(xb, w1, b1, w2, b2)
    assert outb.shape == (n_big, 1)
    assert jnp.allclose(outb, refb, atol=ATOL, rtol=RTOL), "mismatch vs reference (large)"

    print("KERNEL_OK")
</pallas_src>

<mosaic_0001>
module attributes {stable_mosaic.version = 11 : i64} {
  func.func @_saliency_kernel(%arg0: i32, %arg1: memref<128x128xf32, #tpu.memory_space<vmem>>, %arg2: memref<64x128xf32, #tpu.memory_space<vmem>>, %arg3: memref<64x1xf32, #tpu.memory_space<vmem>>, %arg4: memref<4x64xf32, #tpu.memory_space<vmem>>, %arg5: memref<1xf32, #tpu.memory_space<smem>>, %arg6: memref<4x128xf32, #tpu.memory_space<vmem>>) attributes {dimension_semantics = [#tpu.dimension_semantics<parallel>], iteration_bounds = array<i64: 2>, scalar_prefetch = 0 : i64, scratch_operands = 0 : i64, tpu.core_type = #tpu.core_type<tc>, window_params = [{transform_indices = @transform_0, window_bounds = array<i64: 128, 128>}, {pipeline_mode = #tpu.pipeline_mode<synchronous>, transform_indices = @transform_1, window_bounds = array<i64: 64, 128>}, {pipeline_mode = #tpu.pipeline_mode<synchronous>, transform_indices = @transform_2, window_bounds = array<i64: 64, 1>}, {pipeline_mode = #tpu.pipeline_mode<synchronous>, transform_indices = @transform_3, window_bounds = array<i64: 4, 64>}, {transform_indices = @transform_4, window_bounds = array<i64: 1>}, {transform_indices = @transform_5, window_bounds = array<i64: 4, 128>}]} {
    %c0 = arith.constant 0 : index
    %c0_0 = arith.constant 0 : index
    %0 = vector.load %arg1[%c0, %c0_0] : memref<128x128xf32, #tpu.memory_space<vmem>>, vector<128x128xf32>
    %c0_1 = arith.constant 0 : index
    %c0_2 = arith.constant 0 : index
    %1 = vector.load %arg2[%c0_1, %c0_2] : memref<64x128xf32, #tpu.memory_space<vmem>>, vector<64x128xf32>
    %cst = arith.constant dense<0.000000e+00> : vector<64x128xf32>
    %2 = tpu.matmul %1, %0, %cst {dimension_numbers = #tpu.dot_dimension_numbers<[1], [1], [0], [0], [0, 0, 1, 0], [], []>} : vector<64x128xf32>, vector<128x128xf32>, vector<64x128xf32> -> vector<64x128xf32>
    %c0_3 = arith.constant 0 : index
    %c0_4 = arith.constant 0 : index
    %3 = vector.load %arg3[%c0_3, %c0_4] : memref<64x1xf32, #tpu.memory_space<vmem>>, vector<64x1xf32>
    %4 = vector.broadcast %3 : vector<64x1xf32> to vector<64x128xf32>
    %5 = arith.addf %2, %4 : vector<64x128xf32>
    %cst_5 = arith.constant 0.000000e+00 : f32
    %6 = vector.broadcast %cst_5 : f32 to vector<64x128xf32>
    %7 = arith.maximumf %5, %6 : vector<64x128xf32>
    %c0_6 = arith.constant 0 : index
    %c0_7 = arith.constant 0 : index
    %8 = vector.load %arg4[%c0_6, %c0_7] : memref<4x64xf32, #tpu.memory_space<vmem>>, vector<4x64xf32>
    %cst_8 = arith.constant dense<0.000000e+00> : vector<4x128xf32>
    %9 = tpu.matmul %8, %7, %cst_8 {dimension_numbers = #tpu.dot_dimension_numbers<[1], [0], [0], [1], [0, 0, 1, 1], [], []>} : vector<4x64xf32>, vector<64x128xf32>, vector<4x128xf32> -> vector<4x128xf32>
    %c0_9 = arith.constant 0 : index
    %10 = memref.load %arg5[%c0_9] : memref<1xf32, #tpu.memory_space<smem>>
    %11 = vector.broadcast %10 : f32 to vector<4x128xf32>
    %12 = arith.addf %9, %11 : vector<4x128xf32>
    %cst_10 = arith.constant 5.000000e-01 : f32
    %13 = vector.broadcast %cst_10 : f32 to vector<4x128xf32>
    %14 = arith.mulf %13, %12 : vector<4x128xf32>
    %15 = math.tanh %14 : vector<4x128xf32>
    %cst_11 = arith.constant 5.000000e-01 : f32
    %16 = vector.broadcast %cst_11 : f32 to vector<4x128xf32>
    %17 = arith.mulf %16, %15 : vector<4x128xf32>
    %cst_12 = arith.constant 5.000000e-01 : f32
    %18 = vector.broadcast %cst_12 : f32 to vector<4x128xf32>
    %19 = arith.addf %17, %18 : vector<4x128xf32>
    %c0_13 = arith.constant 0 : index
    %c0_14 = arith.constant 0 : index
    %20 = vector.load %arg6[%c0_13, %c0_14] : memref<4x128xf32, #tpu.memory_space<vmem>>, vector<4x128xf32>
    tpu.vector_store %arg6[%c0_13, %c0_14], %19 {strides = array<i32>} : memref<4x128xf32, #tpu.memory_space<vmem>>, vector<4x128xf32>,
    return
  }
  func.func @transform_0(%arg0: i32) -> (i32, i32) {
    %c0_i32 = arith.constant 0 : i32
    %c0_i32_0 = arith.constant 0 : i32
    return %arg0, %c0_i32 : i32, i32
  }
  func.func @transform_1(%arg0: i32) -> (i32, i32) {
    %c0_i32 = arith.constant 0 : i32
    %c0_i32_0 = arith.constant 0 : i32
    %c0_i32_1 = arith.constant 0 : i32
    return %c0_i32, %c0_i32_0 : i32, i32
  }
  func.func @transform_2(%arg0: i32) -> (i32, i32) {
    %c0_i32 = arith.constant 0 : i32
    %c0_i32_0 = arith.constant 0 : i32
    %c0_i32_1 = arith.constant 0 : i32
    return %c0_i32, %c0_i32_0 : i32, i32
  }
  func.func @transform_3(%arg0: i32) -> (i32, i32) {
    %c0_i32 = arith.constant 0 : i32
    %c0_i32_0 = arith.constant 0 : i32
    %c0_i32_1 = arith.constant 0 : i32
    return %c0_i32, %c0_i32_0 : i32, i32
  }
  func.func @transform_4(%arg0: i32) -> i32 {
    %c0_i32 = arith.constant 0 : i32
    %c0_i32_0 = arith.constant 0 : i32
    return %c0_i32 : i32
  }
  func.func @transform_5(%arg0: i32) -> (i32, i32) {
    %c0_i32 = arith.constant 0 : i32
    %c0_i32_0 = arith.constant 0 : i32
    return %c0_i32, %arg0 : i32, i32
  }
}

</mosaic_0001>

<bundles_post_ra>
// kernel: tile.6
= control target key start
LH: loop header
LB: loop body
LE: loop exit
PB: predicated region body
PF: predicated region fallthrough
CT: control target
= control target key end

     0   :  { %s22_s0 = inlined_call_operand.vmem [shape: f32[16], index: 0, kind: input, shape index: {}]   ;;  %s23_s1 = inlined_call_operand.vmem [shape: f32[4,16], index: 1, kind: output, shape index: {}]  }
   0x1   :  { %v4_v0 = vld [vmem:[%s22_s0] ss:$0 sm:$0xff] }
   0x2   :  { %5 = vst [vmem:[%s23_s1] sm:$0xf] %v4_v0 }

// kernel: tile.0
= control target key start
LH: loop header
LB: loop body
LE: loop exit
PB: predicated region body
PF: predicated region fallthrough
CT: control target
= control target key end

     0   :  { %s176_s8 = smov 125   ;;  %s177_s9 = smov 126   ;;  %vm7_vm0 = vcmask 7168   ;;  %s331_s0 = inlined_call_operand.vmem [shape: f32[4,16], index: 0, kind: input, shape index: {}]   ;;  %s332_s1 = inlined_call_operand.vmem [shape: f32[64,1], index: 1, kind: output, shape index: {}]  }
   0x1   :  { %v4_v0 = vld [vmem:[%s331_s0] sm:$0xf]  ;;  %s175_s0 = smov 127   ;;  %s178_s10 = smov 124  }
   0x2   :  { %5 = vst [vmem:[#allocation0] sm:$0xf] %v4_v0  ;;  %s179_s11 = smov 123   ;;  %s180_s12 = smov 122  }
   0x3   :  { %s181_s13 = smov 121   ;;  %s182_s14 = smov 120  }
   0x4   :  { %s183_s19 = smov 119   ;;  %s184_s20 = smov 118  }
   0x5   :  { %s185_s21 = smov 117   ;;  %s186_s22 = smov 116  }
   0x6   :  { %s187_s23 = smov 115   ;;  %s188_s24 = smov 114  }
   0x7   :  { %s189_s25 = smov 113  }
   0x9   :  { %v10_v1 = vld [vmem:[#allocation0] sm:$0xf]  }
   0xa   :  { %v26_v2 = vld [vmem:[#allocation0] sm:$0xf]   ;;  %11 = vrot.lane.b32.xlu0 %v10_v1, %s175_s0 }
   0xb   :  { %27 = vrot.lane.b32.xlu1 %v26_v2, %s176_s8  ;;  %v18_v3 = vld [vmem:[#allocation0] sm:$0xf]  }
   0xc   :  { %v34_v4 = vld [vmem:[#allocation0] sm:$0xf]  }
   0xd   :  { %v42_v5 = vld [vmem:[#allocation0] sm:$0xf]  }
   0xe   :  { %19 = vrot.lane.b32.xlu0 %v18_v3, %s177_s9  ;;  %v50_v6 = vld [vmem:[#allocation0] sm:$0xf]  }
   0xf   :  { %35 = vrot.lane.b32.xlu1 %v34_v4, %s178_s10  ;;  %v58_v7 = vld [vmem:[#allocation0] sm:$0xf]  }
  0x10   :  { %v66_v8 = vld [vmem:[#allocation0] sm:$0xf]  }
  0x11   :  { %v74_v9 = vld [vmem:[#allocation0] sm:$0xf]  }
  0x12   :  { %43 = vrot.lane.b32.xlu0 %v42_v5, %s179_s11  ;;  %v82_v10 = vld [vmem:[#allocation0] sm:$0xf]  }
  0x13   :  { %51 = vrot.lane.b32.xlu1 %v50_v6, %s180_s12  ;;  %v6_v11 = vld [vmem:[#allocation0] sm:$0xf]  }
  0x14   :  { %8 = vst.msk [vmem:[%s332_s1] ss:$16 sm:$0x3] %vm7_vm0, %v6_v11   ;;  %9 = vst.msk [vmem:[%s332_s1] ss:$16 sm:$0xc] %vm7_vm0, %v6_v11  }
  0x15   :  { %v90_v12 = vld [vmem:[#allocation0] sm:$0xf]  }
  0x16   :  { %59 = vrot.lane.b32.xlu0 %v58_v7, %s181_s13  ;;  %v98_v13 = vld [vmem:[#allocation0] sm:$0xf]  }
  0x17   :  { %67 = vrot.lane.b32.xlu1 %v66_v8, %s182_s14  ;;  %v106_v14 = vld [vmem:[#allocation0] sm:$0xf]  }
  0x18   :  { %v114_v15 = vld [vmem:[#allocation0] sm:$0xf]  }
  0x19   :  { %v122_v16 = vld [vmem:[#allocation0] sm:$0xf]  }
  0x1a   :  { %75 = vrot.lane.b32.xlu0 %v74_v9, %s183_s19 }
  0x1b   :  { %83 = vrot.lane.b32.xlu1 %v82_v10, %s184_s20 }
  0x1e   :  { %91 = vrot.lane.b32.xlu0 %v90_v12, %s185_s21 }
  0x1f   :  { %99 = vrot.lane.b32.xlu1 %v98_v13, %s186_s22 }
  0x22   :  { %107 = vrot.lane.b32.xlu0 %v106_v14, %s187_s23 }
  0x23   :  { %115 = vrot.lane.b32.xlu1 %v114_v15, %s188_s24 }
  0x26   :  { %123 = vrot.lane.b32.xlu0 %v122_v16, %s189_s25 }
  0x7c   :  { %v12_v17 = vpop.permute.xlu0 %11  }
  0x7d   :  { %v28_v18 = vpop.permute.xlu1 %27   ;;  %130 = vst.msk [vmem:[%s332_s1 + $0x1] ss:$16 sm:$0x3] %vm7_vm0, %v12_v17   ;;  %131 = vst.msk [vmem:[%s332_s1 + $0x1] ss:$16 sm:$0xc] %vm7_vm0, %v12_v17  }
  0x7e   :  { %134 = vst.msk [vmem:[%s332_s1 + $0x3] ss:$16 sm:$0x3] %vm7_vm0, %v28_v18   ;;  %135 = vst.msk [vmem:[%s332_s1 + $0x3] ss:$16 sm:$0xc] %vm7_vm0, %v28_v18  }
  0x80   :  { %v20_v19 = vpop.permute.xlu0 %19  }
  0x81   :  { %v36_v20 = vpop.permute.xlu1 %35   ;;  %132 = vst.msk [vmem:[%s332_s1 + $0x2] ss:$16 sm:$0x3] %vm7_vm0, %v20_v19   ;;  %133 = vst.msk [vmem:[%s332_s1 + $0x2] ss:$16 sm:$0xc] %vm7_vm0, %v20_v19  }
  0x82   :  { %136 = vst.msk [vmem:[%s332_s1 + $0x4] ss:$16 sm:$0x3] %vm7_vm0, %v36_v20   ;;  %137 = vst.msk [vmem:[%s332_s1 + $0x4] ss:$16 sm:$0xc] %vm7_vm0, %v36_v20  }
  0x84   :  { %v44_v21 = vpop.permute.xlu0 %43  }
  0x85   :  { %v52_v22 = vpop.permute.xlu1 %51   ;;  %138 = vst.msk [vmem:[%s332_s1 + $0x5] ss:$16 sm:$0x3] %vm7_vm0, %v44_v21   ;;  %139 = vst.msk [vmem:[%s332_s1 + $0x5] ss:$16 sm:$0xc] %vm7_vm0, %v44_v21  }
  0x86   :  { %140 = vst.msk [vmem:[%s332_s1 + $0x6] ss:$16 sm:$0x3] %vm7_vm0, %v52_v22   ;;  %141 = vst.msk [vmem:[%s332_s1 + $0x6] ss:$16 sm:$0xc] %vm7_vm0, %v52_v22  }
  0x88   :  { %v60_v23 = vpop.permute.xlu0 %59  }
  0x89   :  { %v68_v24 = vpop.permute.xlu1 %67   ;;  %142 = vst.msk [vmem:[%s332_s1 + $0x7] ss:$16 sm:$0x3] %vm7_vm0, %v60_v23   ;;  %143 = vst.msk [vmem:[%s332_s1 + $0x7] ss:$16 sm:$0xc] %vm7_vm0, %v60_v23  }
  0x8a   :  { %144 = vst.msk [vmem:[%s332_s1 + $0x8] ss:$16 sm:$0x3] %vm7_vm0, %v68_v24   ;;  %145 = vst.msk [vmem:[%s332_s1 + $0x8] ss:$16 sm:$0xc] %vm7_vm0, %v68_v24  }
  0x8c   :  { %v76_v25 = vpop.permute.xlu0 %75  }
  0x8d   :  { %v84_v26 = vpop.permute.xlu1 %83   ;;  %146 = vst.msk [vmem:[%s332_s1 + $0x9] ss:$16 sm:$0x3] %vm7_vm0, %v76_v25   ;;  %147 = vst.msk [vmem:[%s332_s1 + $0x9] ss:$16 sm:$0xc] %vm7_vm0, %v76_v25  }
  0x8e   :  { %148 = vst.msk [vmem:[%s332_s1 + $0xa] ss:$16 sm:$0x3] %vm7_vm0, %v84_v26   ;;  %149 = vst.msk [vmem:[%s332_s1 + $0xa] ss:$16 sm:$0xc] %vm7_vm0, %v84_v26  }
  0x90   :  { %v92_v27 = vpop.permute.xlu0 %91  }
  0x91   :  { %v100_v28 = vpop.permute.xlu1 %99   ;;  %150 = vst.msk [vmem:[%s332_s1 + $0xb] ss:$16 sm:$0x3] %vm7_vm0, %v92_v27   ;;  %151 = vst.msk [vmem:[%s332_s1 + $0xb] ss:$16 sm:$0xc] %vm7_vm0, %v92_v27  }
  0x92   :  { %152 = vst.msk [vmem:[%s332_s1 + $0xc] ss:$16 sm:$0x3] %vm7_vm0, %v100_v28   ;;  %153 = vst.msk [vmem:[%s332_s1 + $0xc] ss:$16 sm:$0xc] %vm7_vm0, %v100_v28  }
  0x94   :  { %v108_v29 = vpop.permute.xlu0 %107  }
  0x95   :  { %v116_v30 = vpop.permute.xlu1 %115   ;;  %154 = vst.msk [vmem:[%s332_s1 + $0xd] ss:$16 sm:$0x3] %vm7_vm0, %v108_v29   ;;  %155 = vst.msk [vmem:[%s332_s1 + $0xd] ss:$16 sm:$0xc] %vm7_vm0, %v108_v29  }
  0x96   :  { %156 = vst.msk [vmem:[%s332_s1 + $0xe] ss:$16 sm:$0x3] %vm7_vm0, %v116_v30   ;;  %157 = vst.msk [vmem:[%s332_s1 + $0xe] ss:$16 sm:$0xc] %vm7_vm0, %v116_v30  }
  0x98   :  { %v124_v31 = vpop.permute.xlu0 %123  }
  0x99   :  { %158 = vst.msk [vmem:[%s332_s1 + $0xf] ss:$16 sm:$0x3] %vm7_vm0, %v124_v31   ;;  %159 = vst.msk [vmem:[%s332_s1 + $0xf] ss:$16 sm:$0xc] %vm7_vm0, %v124_v31  }

// kernel: saliency_regressor.1
= control target key start
LH: loop header
LB: loop body
LE: loop exit
PB: predicated region body
PF: predicated region fallthrough
CT: control target
= control target key end

     0   :  { %s758_s20 = smov 0   ;;  %s849_s0 = inlined_call_operand.vmem [shape: f32[251,128], index: 0, kind: input, shape index: {}]   ;;  %s850_s1 = inlined_call_operand.vmem [shape: f32[64,128], index: 1, kind: input, shape index: {}]   ;;  %s851_s2 = inlined_call_operand.vmem [shape: f32[64,1], index: 2, kind: input, shape index: {}]   ;;  %s852_s3 = inlined_call_operand.vmem [shape: f32[4,64], index: 3, kind: input, shape index: {}]   ;;  %s853_s4 = inlined_call_operand.<no memory space> [shape: f32[1], index: 4, kind: input, shape index: {}]   ;;  %s854_s5 = inlined_call_operand.vmem [shape: f32[4,251], index: 5, kind: output, shape index: {}]  }
   0x1   :  { %10 = sst [smem:[#allocation2]] %s853_s4 }
   0x2 LB: > { %s764_s21 = sadd.s32 4294967295, %s719_s20   ;;  %p550_p0 = scmp.ge.s32.totalorder %s719_s20, 1  ;;  %s719_s20 = sphi %s758_s20, %s16_s20  }
   0x3   : > { %p189_p1 = scmp.lt.s32.totalorder %s719_s20, 3 }
   0x5   : > { %p190_p2 = pnand %p550_p0, %p189_p1 }
   0x6   : > { %s551_s22 = sshll.u32 (!%p190_p2), %s764_s21, 4  ;;  %v242_v0 = vld [vmem:[%s850_s1] sm:$0xff] (!%p190_p2)  ;;  %v721_v1 = vmov (!%p190_p2), 0   ;;  %v252_v3 = vld [vmem:[%s851_s2 + $0x10] sm:$0xff] (!%p190_p2)  ;;  %v251_v4 = vld [vmem:[%s851_s2 + $0x8] sm:$0xff] (!%p190_p2)  ;;  %v722_v41 = vmov (!%p190_p2), 0.0|0.0  }
   0x7   : > { %193 = sbr.rel (%p190_p2) target bundleno = 550 (0x226), region = 40  ;;  %p217_p3 = scmp.lt.s32.totalorder (!%p190_p2), %s551_s22, 31  ;;  %622 = vmatprep.mubr.f32.mxu0 (!%p190_p2), %v242_v0  ;;  %709 = vset.pattern.permute.xlu0 (!%p190_p2), %v721_v1  ;;  %v250_v2 = vld [vmem:[%s851_s2] sm:$0xff] (!%p190_p2)  ;;  %v253_v5 = vld [vmem:[%s851_s2 + $0x18] sm:$0xff] (!%p190_p2)  ;;  %v255_v13 = vld [vmem:[%s851_s2 + $0x28] sm:$0xff] (!%p190_p2)  ;;  %vm723_vm0 = vmmov (!%p190_p2), 0  }
   0x8   : > { %710 = vset.pattern.permute.xlu1 (!%p190_p2), %v721_v1  ;;  %260 = vperm.xlu0 (!%p190_p2), %709, %v250_v2   ;;  %v254_v11 = vld [vmem:[%s851_s2 + $0x20] sm:$0xff] (!%p190_p2)  ;;  %v256_v14 = vld [vmem:[%s851_s2 + $0x30] sm:$0xff] (!%p190_p2)  ;;  %v257_v17 = vld [vmem:[%s851_s2 + $0x38] sm:$0xff] (!%p190_p2)  ;;  %v724_v42 = vmov (!%p190_p2), 0.0   ;;  %vm414_vm1 = vcmask (!%p190_p2), 523264   ;;  %s412_s11 = sld [smem:[#allocation2]] (!%p190_p2) }
   0x9   : > { %270 = vperm.xlu1 (!%p190_p2), %710, %v252_v3   ;;  %v243_v34 = vld [vmem:[%s850_s1 + $0x8] sm:$0xff] (!%p190_p2)  ;;  %v244_v35 = vld [vmem:[%s850_s1 + $0x10] sm:$0xff] (!%p190_p2)  ;;  %v245_v36 = vld [vmem:[%s850_s1 + $0x18] sm:$0xff] (!%p190_p2)  ;;  %685 = vmatprep.subr.bf16.mxu1 (!%p190_p2), %v722_v41  ;;  %p222_p4 = scmp.lt.s32.totalorder (!%p190_p2), %s764_s21, 1 }
   0xa   : > { %v246_v37 = vld [vmem:[%s850_s1 + $0x20] sm:$0xff] (!%p190_p2)  ;;  %v247_v38 = vld [vmem:[%s850_s1 + $0x28] sm:$0xff] (!%p190_p2)  ;;  %v248_v39 = vld [vmem:[%s850_s1 + $0x30] sm:$0xff] (!%p190_p2)  ;;  %650 = vmatprep.mubr.msk.f32.mxu1 (!%p190_p2), %vm723_vm0, %v724_v42 }
   0xb   : > { %v249_v40 = vld [vmem:[%s850_s1 + $0x38] sm:$0xff] (!%p190_p2) }
   0xc   : > { %265 = vperm.xlu0 (!%p190_p2), %709, %v251_v4  }
   0xd   : > { %275 = vperm.xlu1 (!%p190_p2), %710, %v253_v5  }
   0xe   : > { %s856_s22 = smov (!%p217_p3, %s551_s22), 31  ;;  %s858_s21 = smov (!%p222_p4, %s764_s21), 1 }
   0xf   : > { %s552_s30 = sshll.u32 %s856_s22, 3  ;;  %s553_s12 = sshll.u32 %s858_s21, 2 }
  0x10   : > { %s787_s10 = scalar_lea.vmem %s849_s0, %s552_s30  ;;  %280 = vperm.xlu0 %709, %v254_v11   ;;  %s225_s15 = scalar_lea.vmem %s854_s5, %s553_s12 }
  0x11   : > { %v226_v6 = vld [vmem:[%s787_s10] sm:$0xff]  ;;  %v227_v7 = vld [vmem:[%s787_s10 + $0x8] sm:$0xff]  ;;  %v228_v8 = vld [vmem:[%s787_s10 + $0x10] sm:$0xff]  ;;  %285 = vperm.xlu1 %710, %v255_v13  }
  0x12   : > { %v653_v9 = vpack.c.bf16 %v227_v7, %v226_v6  ;;  %v229_v10 = vld [vmem:[%s787_s10 + $0x18] sm:$0xff]  ;;  %v230_v15 = vld [vmem:[%s787_s10 + $0x20] sm:$0xff]  ;;  %v231_v16 = vld [vmem:[%s787_s10 + $0x28] sm:$0xff] }
  0x13   : > { %v657_v12 = vpack.c.bf16 %v229_v10, %v228_v8  ;;  %v661_v18 = vpack.c.bf16 %v231_v16, %v230_v15  ;;  %v232_v19 = vld [vmem:[%s787_s10 + $0x30] sm:$0xff]  ;;  %v233_v20 = vld [vmem:[%s787_s10 + $0x38] sm:$0xff]  ;;  %v234_v22 = vld [vmem:[%s787_s10 + $0x40] sm:$0xff]  ;;  %v413_v16 = vstv %s412_s11 }
  0x14   : > { %654 = vmatprep.subr.bf16.mxu0 %v653_v9  ;;  %290 = vperm.xlu0 %709, %v256_v14   ;;  %v665_v21 = vpack.c.bf16 %v233_v20, %v232_v19  ;;  %v235_v23 = vld [vmem:[%s787_s10 + $0x48] sm:$0xff]  ;;  %v236_v25 = vld [vmem:[%s787_s10 + $0x50] sm:$0xff]  ;;  %v237_v26 = vld [vmem:[%s787_s10 + $0x58] sm:$0xff] }
  0x15   : > { %656 = vmatpush3.bf16.xpose.msra.mxu0 %v653_v9  ;;  %295 = vperm.xlu1 %710, %v257_v17   ;;  %v669_v24 = vpack.c.bf16 %v235_v23, %v234_v22  ;;  %v673_v27 = vpack.c.bf16 %v237_v26, %v236_v25  ;;  %v238_v28 = vld [vmem:[%s787_s10 + $0x60] sm:$0xff]  ;;  %v239_v29 = vld [vmem:[%s787_s10 + $0x68] sm:$0xff]  ;;  %v240_v31 = vld [vmem:[%s787_s10 + $0x70] sm:$0xff] }
  0x16   : > { %658 = vmatprep.subr.bf16.mxu0 %v657_v12  ;;  %v677_v30 = vpack.c.bf16 %v239_v29, %v238_v28  ;;  %v241_v32 = vld [vmem:[%s787_s10 + $0x78] sm:$0xff]  ;;  %v411_v15 = vld [vmem:[%s852_s3] sm:$0xf] }
  0x17   : > { %v681_v33 = vpack.c.bf16 %v241_v32, %v240_v31 }
  0x1d   : > { %660 = vmatpush3.bf16.xpose.msra.mxu0 %v657_v12 }
  0x1e   : > { %662 = vmatprep.subr.bf16.mxu0 %v661_v18 }
  0x25   : > { %664 = vmatpush3.bf16.xpose.msra.mxu0 %v661_v18 }
  0x26   : > { %666 = vmatprep.subr.bf16.mxu0 %v665_v21 }
  0x2d   : > { %668 = vmatpush3.bf16.xpose.msra.mxu0 %v665_v21 }
  0x2e   : > { %670 = vmatprep.subr.bf16.mxu0 %v669_v24 }
  0x35   : > { %672 = vmatpush3.bf16.xpose.msra.mxu0 %v669_v24 }
  0x36   : > { %674 = vmatprep.subr.bf16.mxu0 %v673_v27 }
  0x3d   : > { %676 = vmatpush3.bf16.xpose.msra.mxu0 %v673_v27 }
  0x3e   : > { %678 = vmatprep.subr.bf16.mxu0 %v677_v30 }
  0x45   : > { %680 = vmatpush3.bf16.xpose.msra.mxu0 %v677_v30 }
  0x46   : > { %682 = vmatprep.subr.bf16.mxu0 %v681_v33 }
  0x4d   : > { %684 = vmatpush3.bf16.xpose.msra.mxu0 %v681_v33 }
  0x54   : > { %623 = vmatmul.mubr.f32.vlgmr.msra.gmra.mrb[0].mxu0 %v243_v34 }
  0x55   : > { %625 = vmatprep.mubr.f32.mxu0 %v244_v35 }
  0x58   : > { %626 = vmatmul.mubr.f32.gmra.mrb[2].mxu0 %v245_v36 }
  0x59   : > { %628 = vmatprep.mubr.f32.mxu0 %v246_v37 }
  0x5c   : > { %629 = vmatmul.mubr.f32.gmra.mrb[4].mxu0 %v247_v38 }
  0x5d   : > { %631 = vmatprep.mubr.f32.mxu0 %v248_v39 }
  0x60   : > { %632 = vmatmul.mubr.f32.gmra.mrb[6].mxu0 %v249_v40 }
  0x87   : > { %v261_v43 = vpop.permute.xlu0 %260 }
  0x88   : > { %v271_v44 = vpop.permute.xlu1 %270 }
  0x8b   : > { %v266_v45 = vpop.permute.xlu0 %265 }
  0x8c   : > { %v276_v46 = vpop.permute.xlu1 %275 }
  0x8f   : > { %v281_v59 = vpop.permute.xlu0 %280 }
  0x90   : > { %v286_v56 = vpop.permute.xlu1 %285 }
  0x93   : > { %v291_v7 = vpop.permute.xlu0 %290 }
  0x94   : > { %v296_v4 = vpop.permute.xlu1 %295 }
 0x127   : > { %v624_v47 = vpop.f32.mrb[0].mxu0 }
 0x128   : > { %v370_v48 = vadd.f32 %v624_v47, %v266_v45  ;;  %v364_v49 = vpop.f32.mrb[1].mxu0 }
 0x129   : > { %v365_v50 = vadd.f32 %v364_v49, %v261_v43 }
 0x12a   : > { %v404_v51 = vmax.f32 %v370_v48, 0.0 }
 0x12b   : > { %v403_v52 = vmax.f32 %v365_v50, 0.0  ;;  %v627_v53 = vpop.f32.mrb[2].mxu0 }
 0x12c   : > { %v380_v54 = vadd.f32 %v627_v53, %v276_v46  ;;  %v374_v55 = vpop.f32.mrb[3].mxu0 }
 0x12d   : > { %v375_v57 = vadd.f32 %v374_v55, %v271_v44  ;;  %v686_v58 = vpack.c.bf16 %v404_v51, %v403_v52 }
 0x12e   : > { %v406_v60 = vmax.f32 %v380_v54, 0.0 }
 0x12f   : > { %v405_v61 = vmax.f32 %v375_v57, 0.0  ;;  %v630_v62 = vpop.f32.mrb[4].mxu0  ;;  %687 = vmatpush3.bf16.msra.mxu1 %v686_v58 }
 0x130   : > { %v390_v63 = vadd.f32 %v630_v62, %v286_v56  ;;  %v384_v0 = vpop.f32.mrb[5].mxu0  ;;  %688 = vmatprep.subr.bf16.mxu1 %v722_v41 }
 0x131   : > { %v689_v1 = vpack.c.bf16 %v406_v60, %v405_v61  ;;  %v385_v2 = vadd.f32 %v384_v0, %v281_v59 }
 0x132   : > { %v408_v3 = vmax.f32 %v390_v63, 0.0 }
 0x133   : > { %v407_v5 = vmax.f32 %v385_v2, 0.0  ;;  %v633_v6 = vpop.f32.mrb[6].mxu0  ;;  %690 = vmatpush3.bf16.msra.mxu1 %v689_v1 }
 0x134   : > { %v400_v8 = vadd.f32 %v633_v6, %v296_v4  ;;  %v394_v9 = vpop.f32.mrb[7].mxu0  ;;  %691 = vmatprep.subr.bf16.mxu1 %v722_v41 }
 0x135   : > { %v692_v10 = vpack.c.bf16 %v408_v3, %v407_v5  ;;  %v395_v11 = vadd.f32 %v394_v9, %v291_v7 }
 0x136   : > { %v410_v12 = vmax.f32 %v400_v8, 0.0 }
 0x137   : > { %v409_v13 = vmax.f32 %v395_v11, 0.0  ;;  %693 = vmatpush3.bf16.msra.mxu1 %v692_v10 }
 0x138   : > { %694 = vmatprep.subr.bf16.mxu1 %v722_v41 }
 0x139   : > { %v695_v14 = vpack.c.bf16 %v410_v12, %v409_v13 }
 0x13b   : > { %696 = vmatpush3.bf16.msra.mxu1 %v695_v14 }
 0x13e   : > { %651 = vmatmul.mubr.msk.f32.vlgmr.msra.gmra.mrb[0].mxu1 %vm414_vm1, %v411_v15 }
 0x211   : > { %v484_v17 = vpop.f32.mrb[0].mxu1 }
 0x212   : > { %v485_v18 = vadd.f32 %v484_v17, %v413_v16  ;;  %v652_v19 = vpop.f32.mrb[1].mxu1 }
 0x214   : > { %v488_v20 = vmul.f32 0.5, %v485_v18 }
 0x216   : > { %711 = vtanh.f32 %v488_v20 }
 0x220   : > { %v712_v21 = vpop.eup %711 }
 0x221   : > { %v490_v22 = vmul.f32 0.5, %v712_v21 }
 0x223   : > { %v491_v23 = vadd.f32 0.5, %v490_v22 }
 0x225   : > { %492 = vst [vmem:[%s225_s15] sm:$0xf] %v491_v23 }
 0x226 PF: > { %s16_s20 = sadd.s32 1, %s719_s20  }
 0x227   : > { %p13_p5 = scmp.ge.s32.totalorder %s16_s20, 4  }
 0x229   :  { %15 = sbr.rel (!%p13_p5) target bundleno = 2 (0x2), region = 70 }

</bundles_post_ra>
